<compile_context>
chip_gen: v7x
topology: tpu7x:2x2x1
jax: 0.10.0
libtpu: 0.0.40
codegen_flags: <defaults>
</compile_context>

<pallas_src>
from typing import NamedTuple

import jax
import jax.numpy as jnp
from jax.experimental import pallas as pl
from jax.experimental.pallas import tpu as pltpu


def _round_up(x, m):
    return ((x + m - 1) // m) * m


def mlp_kernel(x_ref, w1_ref, w2_ref, w3_ref, o_ref):
    # Fused Linear -> SiLU -> Linear -> ReLU -> Linear (all bias-free).
    # Matmul operands stay in the weight dtype (bf16 weights -> bf16 MXU path),
    # accumulation is f32; non-linearities run on the f32 accumulator (VPU/EUP).
    x = x_ref[...].astype(w1_ref.dtype)
    h1 = jnp.dot(x, w1_ref[...], preferred_element_type=jnp.float32)
    # SiLU = h1 * sigmoid(h1); the divide goes through the approx EUP reciprocal
    # (separate bundle slot -> essentially free, helps the single-EUP v5e).
    h1 = h1 * pl.reciprocal(1.0 + jnp.exp(-h1), approx=True)
    h2 = jnp.dot(h1.astype(w2_ref.dtype), w2_ref[...],
                 preferred_element_type=jnp.float32)
    h2 = jnp.maximum(h2, 0.0)                             # ReLU
    out = jnp.dot(h2.astype(w3_ref.dtype), w3_ref[...],
                  preferred_element_type=jnp.float32)
    o_ref[...] = out.astype(o_ref.dtype)


class MLPParams(NamedTuple):
    w1: jax.Array          # (in_p,  hid_p)  padded, lane-dense
    w2: jax.Array          # (hid_p, hid_p)
    w3: jax.Array          # (hid_p, out_p)
    input_size: int
    hidden_size: int
    output_size: int


def prepare_weights(w1, w2, w3) -> MLPParams:
    """Pad weight feature dims to multiples of 128 ONCE (zero padding is exact
    for this MLP: zero rows/cols contribute 0 and SiLU(0)=ReLU(0)=0). Call once
    and reuse so the per-inference path never re-reads weights just to pad."""
    input_size, hidden_size = w1.shape
    output_size = w3.shape[1]
    assert w2.shape == (hidden_size, hidden_size)
    assert w3.shape == (hidden_size, output_size)

    in_p, hid_p, out_p = (_round_up(d, 128)
                          for d in (input_size, hidden_size, output_size))
    if (in_p, hid_p) != (input_size, hidden_size):
        w1 = jnp.pad(w1, ((0, in_p - input_size), (0, hid_p - hidden_size)))
    if hid_p != hidden_size:
        w2 = jnp.pad(w2, ((0, hid_p - hidden_size), (0, hid_p - hidden_size)))
    if (hid_p, out_p) != (hidden_size, output_size):
        w3 = jnp.pad(w3, ((0, hid_p - hidden_size), (0, out_p - output_size)))
    return MLPParams(w1, w2, w3, input_size, hidden_size, output_size)


def _vmem_capacity_bytes():
    # Generation-aware: 128 MiB on v5e/v6e, 64 MiB per TensorCore on v7x.
    try:
        return int(pltpu.get_tpu_info().vmem_capacity_bytes)
    except Exception:
        return 64 << 20  # conservative fallback


def mlp_forward(x, params: MLPParams, *, tm=256):
    """x: (..., input_size). Handles 2-D or 3-D inputs like the PyTorch module."""
    w1_p, w2_p, w3_p, input_size, hidden_size, output_size = params
    orig_shape = x.shape
    assert orig_shape[-1] == input_size

    x2d = x.reshape(-1, input_size)
    m = x2d.shape[0]
    in_p, hid_p = w1_p.shape
    out_p = w3_p.shape[1]

    # Lane-dense feature pad of x only when input_size isn't already 128-aligned.
    if in_p != input_size:
        x2d = jnp.pad(x2d, ((0, 0), (0, in_p - input_size)))

    # Row tile: multiple of the sublane packing (8 for 32-bit, 16 for bf16/f16).
    sublane = 8 if jnp.dtype(x.dtype).itemsize >= 4 else 16
    tm_eff = _round_up(min(tm, _round_up(m, sublane)), sublane)
    grid_m = pl.cdiv(m, tm_eff)        # no M padding; ragged last block is fine

    bpe_x = jnp.dtype(x.dtype).itemsize
    bpe_w = jnp.dtype(w1_p.dtype).itemsize
    w_bytes = (in_p * hid_p + hid_p * hid_p + hid_p * out_p) * bpe_w  # 1 buffer
    io_bytes = 2 * tm_eff * (in_p + out_p) * bpe_x                    # 2-buffered tiles
    interm_bytes = tm_eff * (2 * hid_p + out_p) * 4                   # f32 h1/h2/out
    internal = 2 << 20                                                # Mosaic scratch
    capacity = _vmem_capacity_bytes()
    needed = int((w_bytes + io_bytes + interm_bytes + internal) * 1.15)
    if needed > capacity:
        # TODO(synk): tile the hidden dim (extra "arbitrary" grid axis over hid_p
        # with an f32 accumulator scratch + pl.when init/finalize) so weights that
        # can't be VMEM-resident (e.g. 4096-hidden bf16 on v7x) stream instead.
        raise ValueError(
            f"MLP needs ~{needed / 2**20:.1f} MiB VMEM "
            f"(> {capacity / 2**20:.1f} MiB available); hidden-dim tiling "
            "is not implemented yet.")

    cost = pl.CostEstimate(
        flops=2 * m * (input_size * hidden_size
                       + hidden_size * hidden_size
                       + hidden_size * output_size),
        transcendentals=m * hidden_size,
        bytes_accessed=(m * input_size * bpe_x
                        + (in_p * hid_p + hid_p * hid_p + hid_p * out_p) * bpe_w
                        + m * output_size * bpe_x),
    )

    def build(single_buffer_weights):
        wbuf = 1 if single_buffer_weights else 2
        limit = min(int((wbuf * w_bytes + io_bytes + interm_bytes + internal) * 1.15),
                    capacity)
        wkw = {"pipeline_mode": pl.Buffered(1)} if single_buffer_weights else {}
        return pl.pallas_call(
            mlp_kernel,
            out_shape=jax.ShapeDtypeStruct((m, out_p), x.dtype),
            grid=(grid_m,),
            in_specs=[
                pl.BlockSpec((tm_eff, in_p), lambda i: (i, 0)),      # x tile (pipelined)
                pl.BlockSpec((in_p, hid_p), lambda i: (0, 0), **wkw),   # w1 resident
                pl.BlockSpec((hid_p, hid_p), lambda i: (0, 0), **wkw),  # w2 resident
                pl.BlockSpec((hid_p, out_p), lambda i: (0, 0), **wkw),  # w3 resident
            ],
            out_specs=pl.BlockSpec((tm_eff, out_p), lambda i: (i, 0)),
            compiler_params=pltpu.CompilerParams(
                dimension_semantics=("parallel",),   # split M across TCs (v7x/megacore)
                vmem_limit_bytes=limit,
            ),
            cost_estimate=cost,
        )

    try:
        out = build(True)(x2d, w1_p, w2_p, w3_p)
    except Exception:
        # Fallback for jax builds where single-buffered (Buffered(1)) BlockSpecs
        # don't lower; identical semantics, just 2x weight VMEM.
        out = build(False)(x2d, w1_p, w2_p, w3_p)

    if out_p != output_size:
        out = out[:, :output_size]
    return out.reshape(*orig_shape[:-1], output_size)


def init_params(key, input_size, hidden_size, output_size, dtype=jnp.float32):
    """Deterministic init. PyTorch Linear weight is (out, in); we store the
    transpose (in, out) so the kernel computes x @ W directly."""
    k1, k2, k3 = jax.random.split(key, 3)

    def kaiming_uniform(k, fan_in, shape):
        bound = 1.0 / jnp.sqrt(fan_in)
        return jax.random.uniform(k, shape, dtype, -bound, bound)

    w1 = kaiming_uniform(k1, input_size, (input_size, hidden_size))
    w2 = kaiming_uniform(k2, hidden_size, (hidden_size, hidden_size))
    w3 = kaiming_uniform(k3, hidden_size, (hidden_size, output_size))
    return w1, w2, w3


def mlp_reference(x, w1, w2, w3):
    """Pure-JAX reference for correctness check."""
    h1 = x @ w1
    h1 = h1 * jax.nn.sigmoid(h1)
    h2 = jnp.maximum(h1 @ w2, 0.0)
    return h2 @ w3


if __name__ == "__main__":
    key = jax.random.PRNGKey(0)
    k_x, k_p = jax.random.split(key)

    batch, seq, input_size, hidden_size, output_size = 2, 8, 16, 32, 8

    x = jax.random.normal(k_x, (batch, seq, input_size), dtype=jnp.float32)
    w1, w2, w3 = init_params(k_p, input_size, hidden_size, output_size)
    params = prepare_weights(w1, w2, w3)   # pad weights once, reuse for every call

    # 3-D input path (batch, seq, input_size), matching the module's reshape logic.
    out = jax.block_until_ready(mlp_forward(x, params))
    ref = mlp_reference(x, w1, w2, w3)
    assert out.shape == (batch, seq, output_size), out.shape
    assert jnp.allclose(out, ref, atol=1e-2, rtol=1e-2), "mismatch vs reference (3-D)"

    # 2-D input path.
    x2 = jax.random.normal(k_x, (batch * seq, input_size), dtype=jnp.float32)
    out2 = jax.block_until_ready(mlp_forward(x2, params))
    assert out2.shape == (batch * seq, output_size)
    assert jnp.allclose(out2, mlp_reference(x2, w1, w2, w3),
                        atol=1e-2, rtol=1e-2), "mismatch vs reference (2-D)"

    # Multi-tile grid with a ragged last block (M not divisible by the row tile).
    k_x3, _ = jax.random.split(k_x)
    x3 = jax.random.normal(k_x3, (40, input_size), dtype=jnp.float32)
    out3 = jax.block_until_ready(mlp_forward(x3, params, tm=16))
    assert out3.shape == (40, output_size)
    assert jnp.allclose(out3, mlp_reference(x3, w1, w2, w3),
                        atol=1e-2, rtol=1e-2), "mismatch vs reference (ragged tiles)"

    # bf16 weights/activations: exercises the bf16 MXU path (in-kernel astype).
    params_bf16 = prepare_weights(w1.astype(jnp.bfloat16),
                                  w2.astype(jnp.bfloat16),
                                  w3.astype(jnp.bfloat16))
    x_bf16 = x.astype(jnp.bfloat16)
    out_bf16 = jax.block_until_ready(mlp_forward(x_bf16, params_bf16))
    assert out_bf16.shape == (batch, seq, output_size)
    assert out_bf16.dtype == jnp.bfloat16
    assert jnp.allclose(out_bf16.astype(jnp.float32), ref,
                        atol=1e-1, rtol=1e-1), "mismatch vs reference (bf16)"

    print("KERNEL_OK")
</pallas_src>

<mosaic_0001>
module attributes {stable_mosaic.version = 11 : i64} {
  func.func @mlp_kernel(%arg0: i32, %arg1: memref<16x128xf32, #tpu.memory_space<vmem>>, %arg2: memref<128x128xf32, #tpu.memory_space<vmem>>, %arg3: memref<128x128xf32, #tpu.memory_space<vmem>>, %arg4: memref<128x128xf32, #tpu.memory_space<vmem>>, %arg5: memref<16x128xf32, #tpu.memory_space<vmem>>) attributes {dimension_semantics = [#tpu.dimension_semantics<parallel>], iteration_bounds = array<i64: 1>, scalar_prefetch = 0 : i64, scratch_operands = 0 : i64, tpu.core_type = #tpu.core_type<tc>, window_params = [{transform_indices = @transform_0, window_bounds = array<i64: 16, 128>}, {pipeline_mode = #tpu.pipeline_mode<synchronous>, transform_indices = @transform_1, window_bounds = array<i64: 128, 128>}, {pipeline_mode = #tpu.pipeline_mode<synchronous>, transform_indices = @transform_2, window_bounds = array<i64: 128, 128>}, {pipeline_mode = #tpu.pipeline_mode<synchronous>, transform_indices = @transform_3, window_bounds = array<i64: 128, 128>}, {transform_indices = @transform_4, window_bounds = array<i64: 16, 128>}]} {
    %c0 = arith.constant 0 : index
    %c0_0 = arith.constant 0 : index
    %0 = vector.load %arg1[%c0, %c0_0] : memref<16x128xf32, #tpu.memory_space<vmem>>, vector<16x128xf32>
    %c0_1 = arith.constant 0 : index
    %c0_2 = arith.constant 0 : index
    %1 = vector.load %arg2[%c0_1, %c0_2] : memref<128x128xf32, #tpu.memory_space<vmem>>, vector<128x128xf32>
    %cst = arith.constant dense<0.000000e+00> : vector<16x128xf32>
    %2 = tpu.matmul %0, %1, %cst {dimension_numbers = #tpu.dot_dimension_numbers<[1], [0], [0], [1], [0, 0, 1, 1], [], []>} : vector<16x128xf32>, vector<128x128xf32>, vector<16x128xf32> -> vector<16x128xf32>
    %cst_3 = arith.constant 0.000000e+00 : f32
    %3 = vector.broadcast %cst_3 : f32 to vector<16x128xf32>
    %4 = arith.subf %3, %2 : vector<16x128xf32>
    %5 = math.exp %4 : vector<16x128xf32>
    %cst_4 = arith.constant 1.000000e+00 : f32
    %6 = vector.broadcast %cst_4 : f32 to vector<16x128xf32>
    %7 = arith.addf %6, %5 : vector<16x128xf32>
    %8 = tpu.reciprocal %7 {approx = true} : vector<16x128xf32> -> vector<16x128xf32>
    %9 = arith.mulf %2, %8 : vector<16x128xf32>
    %c0_5 = arith.constant 0 : index
    %c0_6 = arith.constant 0 : index
    %10 = vector.load %arg3[%c0_5, %c0_6] : memref<128x128xf32, #tpu.memory_space<vmem>>, vector<128x128xf32>
    %cst_7 = arith.constant dense<0.000000e+00> : vector<16x128xf32>
    %11 = tpu.matmul %9, %10, %cst_7 {dimension_numbers = #tpu.dot_dimension_numbers<[1], [0], [0], [1], [0, 0, 1, 1], [], []>} : vector<16x128xf32>, vector<128x128xf32>, vector<16x128xf32> -> vector<16x128xf32>
    %cst_8 = arith.constant 0.000000e+00 : f32
    %12 = vector.broadcast %cst_8 : f32 to vector<16x128xf32>
    %13 = arith.maximumf %11, %12 : vector<16x128xf32>
    %c0_9 = arith.constant 0 : index
    %c0_10 = arith.constant 0 : index
    %14 = vector.load %arg4[%c0_9, %c0_10] : memref<128x128xf32, #tpu.memory_space<vmem>>, vector<128x128xf32>
    %cst_11 = arith.constant dense<0.000000e+00> : vector<16x128xf32>
    %15 = tpu.matmul %13, %14, %cst_11 {dimension_numbers = #tpu.dot_dimension_numbers<[1], [0], [0], [1], [0, 0, 1, 1], [], []>} : vector<16x128xf32>, vector<128x128xf32>, vector<16x128xf32> -> vector<16x128xf32>
    %c0_12 = arith.constant 0 : index
    %c0_13 = arith.constant 0 : index
    %16 = vector.load %arg5[%c0_12, %c0_13] : memref<16x128xf32, #tpu.memory_space<vmem>>, vector<16x128xf32>
    tpu.vector_store %arg5[%c0_12, %c0_13], %15 {strides = array<i32>} : memref<16x128xf32, #tpu.memory_space<vmem>>, vector<16x128xf32>,
    return
  }
  func.func @transform_0(%arg0: i32) -> (i32, i32) {
    %c0_i32 = arith.constant 0 : i32
    %c0_i32_0 = arith.constant 0 : i32
    return %arg0, %c0_i32 : i32, i32
  }
  func.func @transform_1(%arg0: i32) -> (i32, i32) {
    %c0_i32 = arith.constant 0 : i32
    %c0_i32_0 = arith.constant 0 : i32
    %c0_i32_1 = arith.constant 0 : i32
    return %c0_i32, %c0_i32_0 : i32, i32
  }
  func.func @transform_2(%arg0: i32) -> (i32, i32) {
    %c0_i32 = arith.constant 0 : i32
    %c0_i32_0 = arith.constant 0 : i32
    %c0_i32_1 = arith.constant 0 : i32
    return %c0_i32, %c0_i32_0 : i32, i32
  }
  func.func @transform_3(%arg0: i32) -> (i32, i32) {
    %c0_i32 = arith.constant 0 : i32
    %c0_i32_0 = arith.constant 0 : i32
    %c0_i32_1 = arith.constant 0 : i32
    return %c0_i32, %c0_i32_0 : i32, i32
  }
  func.func @transform_4(%arg0: i32) -> (i32, i32) {
    %c0_i32 = arith.constant 0 : i32
    %c0_i32_0 = arith.constant 0 : i32
    return %arg0, %c0_i32 : i32, i32
  }
}

module attributes {stable_mosaic.version = 11 : i64} {
  func.func @mlp_kernel(%arg0: i32, %arg1: memref<16x128xf32, #tpu.memory_space<vmem>>, %arg2: memref<128x128xf32, #tpu.memory_space<vmem>>, %arg3: memref<128x128xf32, #tpu.memory_space<vmem>>, %arg4: memref<128x128xf32, #tpu.memory_space<vmem>>, %arg5: memref<16x128xf32, #tpu.memory_space<vmem>>) attributes {dimension_semantics = [#tpu.dimension_semantics<parallel>], iteration_bounds = array<i64: 1>, scalar_prefetch = 0 : i64, scratch_operands = 0 : i64, tpu.core_type = #tpu.core_type<tc>, window_params = [{transform_indices = @transform_0, window_bounds = array<i64: 16, 128>}, {pipeline_mode = #tpu.pipeline_mode<synchronous>, transform_indices = @transform_1, window_bounds = array<i64: 128, 128>}, {pipeline_mode = #tpu.pipeline_mode<synchronous>, transform_indices = @transform_2, window_bounds = array<i64: 128, 128>}, {pipeline_mode = #tpu.pipeline_mode<synchronous>, transform_indices = @transform_3, window_bounds = array<i64: 128, 128>}, {transform_indices = @transform_4, window_bounds = array<i64: 16, 128>}]} {
    %c0 = arith.constant 0 : index
    %c0_0 = arith.constant 0 : index
    %0 = vector.load %arg1[%c0, %c0_0] : memref<16x128xf32, #tpu.memory_space<vmem>>, vector<16x128xf32>
    %c0_1 = arith.constant 0 : index
    %c0_2 = arith.constant 0 : index
    %1 = vector.load %arg2[%c0_1, %c0_2] : memref<128x128xf32, #tpu.memory_space<vmem>>, vector<128x128xf32>
    %cst = arith.constant dense<0.000000e+00> : vector<16x128xf32>
    %2 = tpu.matmul %0, %1, %cst {dimension_numbers = #tpu.dot_dimension_numbers<[1], [0], [0], [1], [0, 0, 1, 1], [], []>} : vector<16x128xf32>, vector<128x128xf32>, vector<16x128xf32> -> vector<16x128xf32>
    %cst_3 = arith.constant 0.000000e+00 : f32
    %3 = vector.broadcast %cst_3 : f32 to vector<16x128xf32>
    %4 = arith.subf %3, %2 : vector<16x128xf32>
    %5 = math.exp %4 : vector<16x128xf32>
    %cst_4 = arith.constant 1.000000e+00 : f32
    %6 = vector.broadcast %cst_4 : f32 to vector<16x128xf32>
    %7 = arith.addf %6, %5 : vector<16x128xf32>
    %8 = tpu.reciprocal %7 {approx = true} : vector<16x128xf32> -> vector<16x128xf32>
    %9 = arith.mulf %2, %8 : vector<16x128xf32>
    %c0_5 = arith.constant 0 : index
    %c0_6 = arith.constant 0 : index
    %10 = vector.load %arg3[%c0_5, %c0_6] : memref<128x128xf32, #tpu.memory_space<vmem>>, vector<128x128xf32>
    %cst_7 = arith.constant dense<0.000000e+00> : vector<16x128xf32>
    %11 = tpu.matmul %9, %10, %cst_7 {dimension_numbers = #tpu.dot_dimension_numbers<[1], [0], [0], [1], [0, 0, 1, 1], [], []>} : vector<16x128xf32>, vector<128x128xf32>, vector<16x128xf32> -> vector<16x128xf32>
    %cst_8 = arith.constant 0.000000e+00 : f32
    %12 = vector.broadcast %cst_8 : f32 to vector<16x128xf32>
    %13 = arith.maximumf %11, %12 : vector<16x128xf32>
    %c0_9 = arith.constant 0 : index
    %c0_10 = arith.constant 0 : index
    %14 = vector.load %arg4[%c0_9, %c0_10] : memref<128x128xf32, #tpu.memory_space<vmem>>, vector<128x128xf32>
    %cst_11 = arith.constant dense<0.000000e+00> : vector<16x128xf32>
    %15 = tpu.matmul %13, %14, %cst_11 {dimension_numbers = #tpu.dot_dimension_numbers<[1], [0], [0], [1], [0, 0, 1, 1], [], []>} : vector<16x128xf32>, vector<128x128xf32>, vector<16x128xf32> -> vector<16x128xf32>
    %c0_12 = arith.constant 0 : index
    %c0_13 = arith.constant 0 : index
    %16 = vector.load %arg5[%c0_12, %c0_13] : memref<16x128xf32, #tpu.memory_space<vmem>>, vector<16x128xf32>
    tpu.vector_store %arg5[%c0_12, %c0_13], %15 {strides = array<i32>} : memref<16x128xf32, #tpu.memory_space<vmem>>, vector<16x128xf32>,
    return
  }
  func.func @transform_0(%arg0: i32) -> (i32, i32) {
    %c0_i32 = arith.constant 0 : i32
    %c0_i32_0 = arith.constant 0 : i32
    return %arg0, %c0_i32 : i32, i32
  }
  func.func @transform_1(%arg0: i32) -> (i32, i32) {
    %c0_i32 = arith.constant 0 : i32
    %c0_i32_0 = arith.constant 0 : i32
    %c0_i32_1 = arith.constant 0 : i32
    return %c0_i32, %c0_i32_0 : i32, i32
  }
  func.func @transform_2(%arg0: i32) -> (i32, i32) {
    %c0_i32 = arith.constant 0 : i32
    %c0_i32_0 = arith.constant 0 : i32
    %c0_i32_1 = arith.constant 0 : i32
    return %c0_i32, %c0_i32_0 : i32, i32
  }
  func.func @transform_3(%arg0: i32) -> (i32, i32) {
    %c0_i32 = arith.constant 0 : i32
    %c0_i32_0 = arith.constant 0 : i32
    %c0_i32_1 = arith.constant 0 : i32
    return %c0_i32, %c0_i32_0 : i32, i32
  }
  func.func @transform_4(%arg0: i32) -> (i32, i32) {
    %c0_i32 = arith.constant 0 : i32
    %c0_i32_0 = arith.constant 0 : i32
    return %arg0, %c0_i32 : i32, i32
  }
}

</mosaic_0001>

<bundles_post_ra>
// kernel: tpu_custom_call.1
= control target key start
LH: loop header
LB: loop body
LE: loop exit
PB: predicated region body
PF: predicated region fallthrough
CT: control target
= control target key end

     0   :  { %9 = vsyncpa [#allocation3], 0  ;;  %s892_s0 = inlined_call_operand.hbm [shape: f32[16,128], index: 0, kind: input, shape index: {}]   ;;  %s893_s1 = inlined_call_operand.hbm [shape: f32[128,128], index: 1, kind: input, shape index: {}]   ;;  %s894_s2 = inlined_call_operand.hbm [shape: f32[128,128], index: 2, kind: input, shape index: {}]   ;;  %s895_s3 = inlined_call_operand.hbm [shape: f32[128,128], index: 3, kind: input, shape index: {}]   ;;  %s896_s4 = inlined_call_operand.hbm [shape: f32[16,128], index: 4, kind: output, shape index: {}]  }
   0x1   :  { %10 = vsyncpa [#allocation6], 0 }
   0x2   :  { %11 = vsyncpa [#allocation9], 0 }
   0x3   :  { %12 = vsyncpa [#allocation4], 0  ;;  %s771_s15 = smov [#allocation5]   ;;  %s772_s17 = smov [#allocation2]  }
   0x4   :  { %s30_s16 = sshll.u32 %s771_s15, 4  ;;  %s18_s18 = sshll.u32 %s772_s17, 4  ;;  %s31_s16 = int_to_ptr.vmem [resolvable:$true] %s30_s16  ;;  %s803_s18 = int_to_ptr.vmem [resolvable:$true] %s18_s18 }
   0x5   :  { %s653_s21 = scalar_lea.hbm %s893_s1, 2048 }
   0x6   :  { %p654_p0 = scmp.ne.s32.totalorder %s893_s1, %s653_s21  ;;  %p657_p1 = scmp.lt.u32.totalorder %s653_s21, %s893_s1 }
   0x8   :  { %p659_p2 = pnand %p657_p1, %p654_p0 }
   0xa   :  { %662 = shalt.err (!%p659_p2)
}
   0xb   :  { %s663_s26 = scalar_lea.vmem %s31_s16, 2048  ;;  %p668_p4 = scmp.lt.s32.totalorder %s31_s16, %s31_s16 }
   0xc   :  { %p664_p3 = scmp.ne.s32.totalorder %s31_s16, %s663_s26  ;;  %p669_p5 = scmp.lt.s32.totalorder %s663_s26, %s663_s26 }
   0xe   :  { %p670_p6 = por %p669_p5, %p668_p4 }
  0x10   :  { %p671_p7 = pnand %p670_p6, %p664_p3 }
  0x12   :  { %674 = shalt.err (!%p671_p7)
}
  0x13   :  { %s773_s27 = smov 128   ;;  %s774_s28 = smov 8  }
  0x14   :  { %36 = dma.hbm_to_vmem [thread:$0]  %s893_s1, 2048, %s31_s16, [#allocation6], %s773_s27, %s773_s27, %s774_s28  }
  0x15   :  { %s675_s7 = scalar_lea.hbm %s892_s0, 256 }
  0x16   :  { %p676_p8 = scmp.ne.s32.totalorder %s892_s0, %s675_s7  ;;  %p679_p9 = scmp.lt.u32.totalorder %s675_s7, %s892_s0 }
  0x18   :  { %p681_p10 = pnand %p679_p9, %p676_p8 }
  0x1a   :  { %684 = shalt.err (!%p681_p10)
}
  0x1b   :  { %s685_s12 = scalar_lea.vmem %s803_s18, 256  ;;  %p690_p12 = scmp.lt.s32.totalorder %s803_s18, %s803_s18 }
  0x1c   :  { %p686_p11 = scmp.ne.s32.totalorder %s803_s18, %s685_s12  ;;  %p691_p13 = scmp.lt.s32.totalorder %s685_s12, %s685_s12 }
  0x1e   :  { %p692_p0 = por %p691_p13, %p690_p12 }
  0x20   :  { %p693_p1 = pnand %p692_p0, %p686_p11 }
  0x22   :  { %696 = shalt.err (!%p693_p1)
}
  0x23   :  { %24 = dma.hbm_to_vmem [thread:$0]  %s892_s0, 256, %s803_s18, [#allocation3], %s773_s27, %s773_s27, %s774_s28  }
  0x24   :  { %s775_s14 = smov [#allocation7]   ;;  %s776_s16 = smov [#allocation8]  }
  0x25   :  { %s42_s15 = sshll.u32 %s775_s14, 4  ;;  %s54_s17 = sshll.u32 %s776_s16, 4  ;;  %s43_s15 = int_to_ptr.vmem [resolvable:$true] %s42_s15  ;;  %s840_s17 = int_to_ptr.vmem [resolvable:$true] %s54_s17 }
  0x26   :  { %s697_s21 = scalar_lea.hbm %s894_s2, 2048 }
  0x27   :  { %p698_p2 = scmp.ne.s32.totalorder %s894_s2, %s697_s21  ;;  %p701_p3 = scmp.lt.u32.totalorder %s697_s21, %s894_s2 }
  0x29   :  { %p703_p4 = pnand %p701_p3, %p698_p2 }
  0x2b   :  { %706 = shalt.err (!%p703_p4)
}
  0x2c   :  { %s707_s0 = scalar_lea.vmem %s43_s15, 2048  ;;  %p712_p6 = scmp.lt.s32.totalorder %s43_s15, %s43_s15 }
  0x2d   :  { %p708_p5 = scmp.ne.s32.totalorder %s43_s15, %s707_s0  ;;  %p713_p7 = scmp.lt.s32.totalorder %s707_s0, %s707_s0 }
  0x2f   :  { %p714_p8 = por %p713_p7, %p712_p6 }
  0x31   :  { %p715_p9 = pnand %p714_p8, %p708_p5 }
  0x33   :  { %718 = shalt.err (!%p715_p9)
}
  0x34   :  { %48 = dma.hbm_to_vmem [thread:$0]  %s894_s2, 2048, %s43_s15, [#allocation6], %s773_s27, %s773_s27, %s774_s28  }
  0x35   :  { %s719_s5 = scalar_lea.hbm %s895_s3, 2048 }
  0x36   :  { %p720_p10 = scmp.ne.s32.totalorder %s895_s3, %s719_s5  ;;  %p723_p11 = scmp.lt.u32.totalorder %s719_s5, %s895_s3 }
  0x38   :  { %p725_p12 = pnand %p723_p11, %p720_p10 }
  0x3a   :  { %728 = shalt.err (!%p725_p12)
}
  0x3b   :  { %s729_s10 = scalar_lea.vmem %s840_s17, 2048  ;;  %p734_p0 = scmp.lt.s32.totalorder %s840_s17, %s840_s17 }
  0x3c   :  { %p730_p13 = scmp.ne.s32.totalorder %s840_s17, %s729_s10  ;;  %p735_p1 = scmp.lt.s32.totalorder %s729_s10, %s729_s10 }
  0x3e   :  { %p736_p2 = por %p735_p1, %p734_p0 }
  0x40   :  { %p737_p3 = pnand %p736_p2, %p730_p13 }
  0x42   :  { %740 = shalt.err (!%p737_p3)
}
  0x43   :  { %60 = dma.hbm_to_vmem [thread:$0]  %s895_s3, 2048, %s840_s17, [#allocation9], %s773_s27, %s773_s27, %s774_s28  }
  0x44   :  { %763 = dma.done.wait [#allocation3], 256  }
  0x45   :  { %764 = vsyncadd [#allocation3], 4294967040 }
  0x46   :  { %765 = dma.done.wait [#allocation6], 4096  }
  0x47   :  { %766 = vsyncadd [#allocation6], 4294963200 }
  0x48   :  { %767 = dma.done.wait [#allocation9], 2048  }
  0x49   :  { %768 = vsyncadd [#allocation9], 4294965248  ;;  %v75_v0 = vld [vmem:[#allocation5] sm:$0xff]  ;;  %v76_v1 = vld [vmem:[#allocation5 + $0x8] sm:$0xff]  ;;  %s777_s3 = smov [#allocation10]  }
  0x4a   :  { %v77_v2 = vld [vmem:[#allocation5 + $0x10] sm:$0xff]  ;;  %v542_v3 = vpack.c.bf16 %v76_v1, %v75_v0  ;;  %v78_v4 = vld [vmem:[#allocation5 + $0x18] sm:$0xff]  ;;  %v79_v6 = vld [vmem:[#allocation5 + $0x20] sm:$0xff]  ;;  %s369_s12 = sshll.u32 %s777_s3, 4  ;;  %s370_s12 = int_to_ptr.vmem [resolvable:$true] %s369_s12 }
  0x4b   :  { %v546_v5 = vpack.c.bf16 %v78_v4, %v77_v2  ;;  %v80_v7 = vld [vmem:[#allocation5 + $0x28] sm:$0xff]  ;;  %v73_v9 = vld [vmem:[#allocation2] sm:$0xff]  ;;  %v82_v11 = vld [vmem:[#allocation5 + $0x38] sm:$0xff]  ;;  %s741_s1 = scalar_lea.vmem %s370_s12, 256  ;;  %p746_p5 = scmp.lt.s32.totalorder %s370_s12, %s370_s12 }
  0x4c   :  { %543 = vmatprep.subr.bf16.mxu0 %v542_v3  ;;  %v550_v8 = vpack.c.bf16 %v80_v7, %v79_v6  ;;  %v81_v10 = vld [vmem:[#allocation5 + $0x30] sm:$0xff]  ;;  %469 = vmatprep.mubr.f32.mxu0 %v73_v9  ;;  %v83_v13 = vld [vmem:[#allocation5 + $0x40] sm:$0xff]  ;;  %v84_v14 = vld [vmem:[#allocation5 + $0x48] sm:$0xff]  ;;  %p742_p4 = scmp.ne.s32.totalorder %s370_s12, %s741_s1  ;;  %p747_p6 = scmp.lt.s32.totalorder %s741_s1, %s741_s1 }
  0x4d   :  { %545 = vmatpush3.bf16.msra.mxu0 %v542_v3  ;;  %v554_v12 = vpack.c.bf16 %v82_v11, %v81_v10  ;;  %v558_v15 = vpack.c.bf16 %v84_v14, %v83_v13  ;;  %v85_v16 = vld [vmem:[#allocation5 + $0x50] sm:$0xff]  ;;  %v86_v17 = vld [vmem:[#allocation5 + $0x58] sm:$0xff]  ;;  %v87_v19 = vld [vmem:[#allocation5 + $0x60] sm:$0xff] }
  0x4e   :  { %547 = vmatprep.subr.bf16.mxu0 %v546_v5  ;;  %v562_v18 = vpack.c.bf16 %v86_v17, %v85_v16  ;;  %v88_v20 = vld [vmem:[#allocation5 + $0x68] sm:$0xff]  ;;  %v89_v22 = vld [vmem:[#allocation5 + $0x70] sm:$0xff]  ;;  %v90_v23 = vld [vmem:[#allocation5 + $0x78] sm:$0xff]  ;;  %p748_p7 = por %p747_p6, %p746_p5 }
  0x4f   :  { %v566_v21 = vpack.c.bf16 %v88_v20, %v87_v19  ;;  %v570_v24 = vpack.c.bf16 %v90_v23, %v89_v22  ;;  %v74_v25 = vld [vmem:[#allocation2 + $0x8] sm:$0xff]  ;;  %v178_v26 = vld [vmem:[#allocation7] sm:$0xff]  ;;  %v179_v27 = vld [vmem:[#allocation7 + $0x8] sm:$0xff] }
  0x50   :  { %v574_v28 = vpack.c.bf16 %v179_v27, %v178_v26  ;;  %v180_v29 = vld [vmem:[#allocation7 + $0x10] sm:$0xff]  ;;  %v181_v30 = vld [vmem:[#allocation7 + $0x18] sm:$0xff]  ;;  %v182_v32 = vld [vmem:[#allocation7 + $0x20] sm:$0xff]  ;;  %p749_p8 = pnand %p748_p7, %p742_p4 }
  0x51   :  { %549 = vmatpush3.bf16.msra.mxu0 %v546_v5  ;;  %v578_v31 = vpack.c.bf16 %v181_v30, %v180_v29  ;;  %v183_v33 = vld [vmem:[#allocation7 + $0x28] sm:$0xff]  ;;  %v184_v35 = vld [vmem:[#allocation7 + $0x30] sm:$0xff]  ;;  %v185_v36 = vld [vmem:[#allocation7 + $0x38] sm:$0xff] }
  0x52   :  { %551 = vmatprep.subr.bf16.mxu0 %v550_v8  ;;  %575 = vmatprep.subr.bf16.mxu1 %v574_v28  ;;  %v582_v34 = vpack.c.bf16 %v183_v33, %v182_v32  ;;  %v586_v37 = vpack.c.bf16 %v185_v36, %v184_v35  ;;  %v186_v38 = vld [vmem:[#allocation7 + $0x40] sm:$0xff]  ;;  %v187_v39 = vld [vmem:[#allocation7 + $0x48] sm:$0xff]  ;;  %v188_v41 = vld [vmem:[#allocation7 + $0x50] sm:$0xff] }
  0x53   :  { %577 = vmatpush3.bf16.msra.mxu1 %v574_v28  ;;  %v590_v40 = vpack.c.bf16 %v187_v39, %v186_v38  ;;  %v189_v42 = vld [vmem:[#allocation7 + $0x58] sm:$0xff]  ;;  %v190_v44 = vld [vmem:[#allocation7 + $0x60] sm:$0xff]  ;;  %v191_v45 = vld [vmem:[#allocation7 + $0x68] sm:$0xff] }
  0x54   :  { %579 = vmatprep.subr.bf16.mxu1 %v578_v31  ;;  %v594_v43 = vpack.c.bf16 %v189_v42, %v188_v41  ;;  %v598_v46 = vpack.c.bf16 %v191_v45, %v190_v44  ;;  %v192_v47 = vld [vmem:[#allocation7 + $0x70] sm:$0xff]  ;;  %v193_v48 = vld [vmem:[#allocation7 + $0x78] sm:$0xff]  ;;  %v271_v50 = vld [vmem:[#allocation8] sm:$0xff] }
  0x55   :  { %553 = vmatpush3.bf16.msra.mxu0 %v550_v8  ;;  %v602_v49 = vpack.c.bf16 %v193_v48, %v192_v47  ;;  %v272_v51 = vld [vmem:[#allocation8 + $0x8] sm:$0xff]  ;;  %v273_v52 = vld [vmem:[#allocation8 + $0x10] sm:$0xff]  ;;  %v274_v54 = vld [vmem:[#allocation8 + $0x18] sm:$0xff] }
  0x56   :  { %555 = vmatprep.subr.bf16.mxu0 %v554_v12  ;;  %v606_v53 = vpack.c.bf16 %v272_v51, %v271_v50  ;;  %v610_v55 = vpack.c.bf16 %v274_v54, %v273_v52  ;;  %v275_v56 = vld [vmem:[#allocation8 + $0x20] sm:$0xff]  ;;  %v276_v57 = vld [vmem:[#allocation8 + $0x28] sm:$0xff]  ;;  %v277_v59 = vld [vmem:[#allocation8 + $0x30] sm:$0xff] }
  0x57   :  { %581 = vmatpush3.bf16.msra.mxu1 %v578_v31  ;;  %v614_v58 = vpack.c.bf16 %v276_v57, %v275_v56  ;;  %v278_v60 = vld [vmem:[#allocation8 + $0x38] sm:$0xff]  ;;  %v279_v62 = vld [vmem:[#allocation8 + $0x40] sm:$0xff]  ;;  %v280_v63 = vld [vmem:[#allocation8 + $0x48] sm:$0xff] }
  0x58   :  { %583 = vmatprep.subr.bf16.mxu1 %v582_v34  ;;  %v618_v61 = vpack.c.bf16 %v278_v60, %v277_v59  ;;  %v622_v0 = vpack.c.bf16 %v280_v63, %v279_v62  ;;  %v281_v1 = vld [vmem:[#allocation8 + $0x50] sm:$0xff]  ;;  %v282_v2 = vld [vmem:[#allocation8 + $0x58] sm:$0xff]  ;;  %v283_v4 = vld [vmem:[#allocation8 + $0x60] sm:$0xff] }
  0x59   :  { %557 = vmatpush3.bf16.msra.mxu0 %v554_v12  ;;  %v626_v3 = vpack.c.bf16 %v282_v2, %v281_v1  ;;  %v284_v5 = vld [vmem:[#allocation8 + $0x68] sm:$0xff]  ;;  %v286_v22 = vld [vmem:[#allocation8 + $0x78] sm:$0xff] }
  0x5a   :  { %559 = vmatprep.subr.bf16.mxu0 %v558_v15  ;;  %v630_v6 = vpack.c.bf16 %v284_v5, %v283_v4 }
  0x5b   :  { %585 = vmatpush3.bf16.msra.mxu1 %v582_v34 }
  0x5c   :  { %587 = vmatprep.subr.bf16.mxu1 %v586_v37 }
  0x5d   :  { %561 = vmatpush3.bf16.msra.mxu0 %v558_v15 }
  0x5e   :  { %563 = vmatprep.subr.bf16.mxu0 %v562_v18 }
  0x5f   :  { %589 = vmatpush3.bf16.msra.mxu1 %v586_v37 }
  0x60   :  { %591 = vmatprep.subr.bf16.mxu1 %v590_v40 }
  0x61   :  { %565 = vmatpush3.bf16.msra.mxu0 %v562_v18 }
  0x62   :  { %567 = vmatprep.subr.bf16.mxu0 %v566_v21 }
  0x63   :  { %593 = vmatpush3.bf16.msra.mxu1 %v590_v40 }
  0x64   :  { %595 = vmatprep.subr.bf16.mxu1 %v594_v43 }
  0x65   :  { %569 = vmatpush3.bf16.msra.mxu0 %v566_v21  ;;  %v285_v21 = vld [vmem:[#allocation8 + $0x70] sm:$0xff] }
  0x66   :  { %571 = vmatprep.subr.bf16.mxu0 %v570_v24  ;;  %v634_v23 = vpack.c.bf16 %v286_v22, %v285_v21 }
  0x67   :  { %597 = vmatpush3.bf16.msra.mxu1 %v594_v43 }
  0x68   :  { %599 = vmatprep.subr.bf16.mxu1 %v598_v46 }
  0x69   :  { %573 = vmatpush3.bf16.msra.mxu0 %v570_v24 }
  0x6a   :  { %607 = vmatprep.subr.bf16.mxu0 %v606_v53 }
  0x6b   :  { %601 = vmatpush3.bf16.msra.mxu1 %v598_v46 }
  0x6c   :  { %470 = vmatmul.mubr.f32.vlgmr.msra.gmra.mrb[0].mxu0 %v74_v25  ;;  %603 = vmatprep.subr.bf16.mxu1 %v602_v49 }
  0x6d   :  { %609 = vmatpush3.bf16.msra.mxu0 %v606_v53 }
  0x6e   :  { %611 = vmatprep.subr.bf16.mxu0 %v610_v55 }
  0x6f   :  { %605 = vmatpush3.bf16.msra.mxu1 %v602_v49 }
  0x71   :  { %613 = vmatpush3.bf16.msra.mxu0 %v610_v55 }
  0x72   :  { %615 = vmatprep.subr.bf16.mxu0 %v614_v58 }
  0x75   :  { %617 = vmatpush3.bf16.msra.mxu0 %v614_v58 }
  0x76   :  { %619 = vmatprep.subr.bf16.mxu0 %v618_v61 }
  0x79   :  { %621 = vmatpush3.bf16.msra.mxu0 %v618_v61 }
  0x7a   :  { %623 = vmatprep.subr.bf16.mxu0 %v622_v0 }
  0x7d   :  { %625 = vmatpush3.bf16.msra.mxu0 %v622_v0 }
  0x7e   :  { %627 = vmatprep.subr.bf16.mxu0 %v626_v3 }
  0x81   :  { %629 = vmatpush3.bf16.msra.mxu0 %v626_v3 }
  0x82   :  { %631 = vmatprep.subr.bf16.mxu0 %v630_v6 }
  0x85   :  { %633 = vmatpush3.bf16.msra.mxu0 %v630_v6 }
  0x86   :  { %635 = vmatprep.subr.bf16.mxu0 %v634_v23 }
  0x89   :  { %637 = vmatpush3.bf16.msra.mxu0 %v634_v23 }
 0x13f   :  { %v471_v7 = vpop.f32.mrb[0].mxu0 }
 0x140   :  { %v167_v8 = vsub.f32 0.0, %v471_v7  ;;  %v157_v9 = vpop.f32.mrb[1].mxu0 }
 0x141   :  { %v166_v10 = vsub.f32 0.0, %v157_v9 }
 0x142   :  { %v170_v11 = vmul.f32 1.442695, %v167_v8 }
 0x143   :  { %v168_v12 = vmul.f32 1.442695, %v166_v10 }
 0x144   :  { %645 = vpow2.f32 %v170_v11 }
 0x145   :  { %647 = vpow2.f32 %v168_v12 }
 0x14e   :  { %v646_v13 = vpop.eup %645 }
 0x14f   :  { %v648_v14 = vpop.eup %647  ;;  %v173_v15 = vadd.f32 1.0, %v646_v13 }
 0x150   :  { %v172_v16 = vadd.f32 1.0, %v648_v14 }
 0x151   :  { %649 = vrcp.f32 %v173_v15 }
 0x152   :  { %651 = vrcp.f32 %v172_v16 }
 0x15b   :  { %v650_v17 = vpop.eup %649 }
 0x15c   :  { %v652_v18 = vpop.eup %651  ;;  %v177_v20 = vmul.f32 %v650_v17, %v471_v7 }
 0x15d   :  { %v176_v19 = vmul.f32 %v652_v18, %v157_v9 }
 0x15f   :  { %504 = vmatprep.mubr.f32.mxu1 %v176_v19 }
 0x160   :  { %505 = vmatmul.mubr.f32.vlgmr.msra.gmra.mrb[0].mxu1 %v177_v20 }
 0x233   :  { %v506_v24 = vpop.f32.mrb[0].mxu1 }
 0x234   :  { %v260_v25 = vpop.f32.mrb[1].mxu1  ;;  %v270_v27 = vmax.f32 %v506_v24, 0.0 }
 0x235   :  { %v269_v26 = vmax.f32 %v260_v25, 0.0 }
 0x237   :  { %539 = vmatprep.mubr.f32.mxu0 %v269_v26 }
 0x238   :  { %540 = vmatmul.mubr.f32.vlgmr.msra.gmra.mrb[2].mxu0 %v270_v27 }
 0x30b   :  { %v541_v28 = vpop.f32.mrb[2].mxu0 }
 0x30c   :  { %363 = vst [vmem:[#allocation10 + $0x8] sm:$0xff] %v541_v28  ;;  %v353_v29 = vpop.f32.mrb[3].mxu0 }
 0x30d   :  { %362 = vst [vmem:[#allocation10] sm:$0xff] %v353_v29 }
 0x30e   :  { %752 = shalt.err (!%p749_p8)
}
 0x30f   :  { %s753_s15 = scalar_lea.hbm %s896_s4, 256 }
 0x310   :  { %p754_p9 = scmp.ne.s32.totalorder %s896_s4, %s753_s15  ;;  %p757_p10 = scmp.lt.u32.totalorder %s753_s15, %s896_s4 }
 0x312   :  { %p759_p11 = pnand %p757_p10, %p754_p9 }
 0x314   :  { %762 = shalt.err (!%p759_p11)
}
 0x315   :  { %375 = dma.vmem_to_hbm [thread:$0]  %s370_s12, 256, %s896_s4, [#allocation4], %s773_s27, %s773_s27, %s774_s28  }
 0x316   :  { %769 = dma.done.wait [#allocation4], 256  }
 0x317   :  { %770 = vsyncadd [#allocation4], 4294967040 }
 0x318   :  { %379 = vsyncpa [#allocation3], 1 }
 0x319   :  { %380 = vsyncpa [#allocation6], 1 }
 0x31a   :  { %381 = vsyncpa [#allocation9], 1 }
 0x31b   :  { %382 = vsyncpa [#allocation4], 1 }

// kernel: tpu_custom_call.1
= control target key start
LH: loop header
LB: loop body
LE: loop exit
PB: predicated region body
PF: predicated region fallthrough
CT: control target
= control target key end

     0   :  { %9 = vsyncpa [#allocation3], 0  ;;  %s892_s0 = inlined_call_operand.hbm [shape: f32[16,128], index: 0, kind: input, shape index: {}]   ;;  %s893_s1 = inlined_call_operand.hbm [shape: f32[128,128], index: 1, kind: input, shape index: {}]   ;;  %s894_s2 = inlined_call_operand.hbm [shape: f32[128,128], index: 2, kind: input, shape index: {}]   ;;  %s895_s3 = inlined_call_operand.hbm [shape: f32[128,128], index: 3, kind: input, shape index: {}]   ;;  %s896_s4 = inlined_call_operand.hbm [shape: f32[16,128], index: 4, kind: output, shape index: {}]  }
   0x1   :  { %10 = vsyncpa [#allocation6], 0 }
   0x2   :  { %11 = vsyncpa [#allocation9], 0 }
   0x3   :  { %12 = vsyncpa [#allocation4], 0  ;;  %s771_s15 = smov [#allocation5]   ;;  %s772_s17 = smov [#allocation2]  }
   0x4   :  { %s30_s16 = sshll.u32 %s771_s15, 4  ;;  %s18_s18 = sshll.u32 %s772_s17, 4  ;;  %s31_s16 = int_to_ptr.vmem [resolvable:$true] %s30_s16  ;;  %s803_s18 = int_to_ptr.vmem [resolvable:$true] %s18_s18 }
   0x5   :  { %s653_s21 = scalar_lea.hbm %s893_s1, 2048 }
   0x6   :  { %p654_p0 = scmp.ne.s32.totalorder %s893_s1, %s653_s21  ;;  %p657_p1 = scmp.lt.u32.totalorder %s653_s21, %s893_s1 }
   0x8   :  { %p659_p2 = pnand %p657_p1, %p654_p0 }
   0xa   :  { %662 = shalt.err (!%p659_p2)
}
   0xb   :  { %s663_s26 = scalar_lea.vmem %s31_s16, 2048  ;;  %p668_p4 = scmp.lt.s32.totalorder %s31_s16, %s31_s16 }
   0xc   :  { %p664_p3 = scmp.ne.s32.totalorder %s31_s16, %s663_s26  ;;  %p669_p5 = scmp.lt.s32.totalorder %s663_s26, %s663_s26 }
   0xe   :  { %p670_p6 = por %p669_p5, %p668_p4 }
  0x10   :  { %p671_p7 = pnand %p670_p6, %p664_p3 }
  0x12   :  { %674 = shalt.err (!%p671_p7)
}
  0x13   :  { %s773_s27 = smov 128   ;;  %s774_s28 = smov 8  }
  0x14   :  { %36 = dma.hbm_to_vmem [thread:$0]  %s893_s1, 2048, %s31_s16, [#allocation6], %s773_s27, %s773_s27, %s774_s28  }
  0x15   :  { %s675_s7 = scalar_lea.hbm %s892_s0, 256 }
  0x16   :  { %p676_p8 = scmp.ne.s32.totalorder %s892_s0, %s675_s7  ;;  %p679_p9 = scmp.lt.u32.totalorder %s675_s7, %s892_s0 }
  0x18   :  { %p681_p10 = pnand %p679_p9, %p676_p8 }
  0x1a   :  { %684 = shalt.err (!%p681_p10)
}
  0x1b   :  { %s685_s12 = scalar_lea.vmem %s803_s18, 256  ;;  %p690_p12 = scmp.lt.s32.totalorder %s803_s18, %s803_s18 }
  0x1c   :  { %p686_p11 = scmp.ne.s32.totalorder %s803_s18, %s685_s12  ;;  %p691_p13 = scmp.lt.s32.totalorder %s685_s12, %s685_s12 }
  0x1e   :  { %p692_p0 = por %p691_p13, %p690_p12 }
  0x20   :  { %p693_p1 = pnand %p692_p0, %p686_p11 }
  0x22   :  { %696 = shalt.err (!%p693_p1)
}
  0x23   :  { %24 = dma.hbm_to_vmem [thread:$0]  %s892_s0, 256, %s803_s18, [#allocation3], %s773_s27, %s773_s27, %s774_s28  }
  0x24   :  { %s775_s14 = smov [#allocation7]   ;;  %s776_s16 = smov [#allocation8]  }
  0x25   :  { %s42_s15 = sshll.u32 %s775_s14, 4  ;;  %s54_s17 = sshll.u32 %s776_s16, 4  ;;  %s43_s15 = int_to_ptr.vmem [resolvable:$true] %s42_s15  ;;  %s840_s17 = int_to_ptr.vmem [resolvable:$true] %s54_s17 }
  0x26   :  { %s697_s21 = scalar_lea.hbm %s894_s2, 2048 }
  0x27   :  { %p698_p2 = scmp.ne.s32.totalorder %s894_s2, %s697_s21  ;;  %p701_p3 = scmp.lt.u32.totalorder %s697_s21, %s894_s2 }
  0x29   :  { %p703_p4 = pnand %p701_p3, %p698_p2 }
  0x2b   :  { %706 = shalt.err (!%p703_p4)
}
  0x2c   :  { %s707_s0 = scalar_lea.vmem %s43_s15, 2048  ;;  %p712_p6 = scmp.lt.s32.totalorder %s43_s15, %s43_s15 }
  0x2d   :  { %p708_p5 = scmp.ne.s32.totalorder %s43_s15, %s707_s0  ;;  %p713_p7 = scmp.lt.s32.totalorder %s707_s0, %s707_s0 }
  0x2f   :  { %p714_p8 = por %p713_p7, %p712_p6 }
  0x31   :  { %p715_p9 = pnand %p714_p8, %p708_p5 }
  0x33   :  { %718 = shalt.err (!%p715_p9)
}
  0x34   :  { %48 = dma.hbm_to_vmem [thread:$0]  %s894_s2, 2048, %s43_s15, [#allocation6], %s773_s27, %s773_s27, %s774_s28  }
  0x35   :  { %s719_s5 = scalar_lea.hbm %s895_s3, 2048 }
  0x36   :  { %p720_p10 = scmp.ne.s32.totalorder %s895_s3, %s719_s5  ;;  %p723_p11 = scmp.lt.u32.totalorder %s719_s5, %s895_s3 }
  0x38   :  { %p725_p12 = pnand %p723_p11, %p720_p10 }
  0x3a   :  { %728 = shalt.err (!%p725_p12)
}
  0x3b   :  { %s729_s10 = scalar_lea.vmem %s840_s17, 2048  ;;  %p734_p0 = scmp.lt.s32.totalorder %s840_s17, %s840_s17 }
  0x3c   :  { %p730_p13 = scmp.ne.s32.totalorder %s840_s17, %s729_s10  ;;  %p735_p1 = scmp.lt.s32.totalorder %s729_s10, %s729_s10 }
  0x3e   :  { %p736_p2 = por %p735_p1, %p734_p0 }
  0x40   :  { %p737_p3 = pnand %p736_p2, %p730_p13 }
  0x42   :  { %740 = shalt.err (!%p737_p3)
}
  0x43   :  { %60 = dma.hbm_to_vmem [thread:$0]  %s895_s3, 2048, %s840_s17, [#allocation9], %s773_s27, %s773_s27, %s774_s28  }
  0x44   :  { %763 = dma.done.wait [#allocation3], 256  }
  0x45   :  { %764 = vsyncadd [#allocation3], 4294967040 }
  0x46   :  { %765 = dma.done.wait [#allocation6], 4096  }
  0x47   :  { %766 = vsyncadd [#allocation6], 4294963200 }
  0x48   :  { %767 = dma.done.wait [#allocation9], 2048  }
  0x49   :  { %768 = vsyncadd [#allocation9], 4294965248  ;;  %v75_v0 = vld [vmem:[#allocation5] sm:$0xff]  ;;  %v76_v1 = vld [vmem:[#allocation5 + $0x8] sm:$0xff]  ;;  %s777_s3 = smov [#allocation10]  }
  0x4a   :  { %v77_v2 = vld [vmem:[#allocation5 + $0x10] sm:$0xff]  ;;  %v542_v3 = vpack.c.bf16 %v76_v1, %v75_v0  ;;  %v78_v4 = vld [vmem:[#allocation5 + $0x18] sm:$0xff]  ;;  %v79_v6 = vld [vmem:[#allocation5 + $0x20] sm:$0xff]  ;;  %s369_s12 = sshll.u32 %s777_s3, 4  ;;  %s370_s12 = int_to_ptr.vmem [resolvable:$true] %s369_s12 }
  0x4b   :  { %v546_v5 = vpack.c.bf16 %v78_v4, %v77_v2  ;;  %v80_v7 = vld [vmem:[#allocation5 + $0x28] sm:$0xff]  ;;  %v73_v9 = vld [vmem:[#allocation2] sm:$0xff]  ;;  %v82_v11 = vld [vmem:[#allocation5 + $0x38] sm:$0xff]  ;;  %s741_s1 = scalar_lea.vmem %s370_s12, 256  ;;  %p746_p5 = scmp.lt.s32.totalorder %s370_s12, %s370_s12 }
  0x4c   :  { %543 = vmatprep.subr.bf16.mxu0 %v542_v3  ;;  %v550_v8 = vpack.c.bf16 %v80_v7, %v79_v6  ;;  %v81_v10 = vld [vmem:[#allocation5 + $0x30] sm:$0xff]  ;;  %469 = vmatprep.mubr.f32.mxu0 %v73_v9  ;;  %v83_v13 = vld [vmem:[#allocation5 + $0x40] sm:$0xff]  ;;  %v84_v14 = vld [vmem:[#allocation5 + $0x48] sm:$0xff]  ;;  %p742_p4 = scmp.ne.s32.totalorder %s370_s12, %s741_s1  ;;  %p747_p6 = scmp.lt.s32.totalorder %s741_s1, %s741_s1 }
  0x4d   :  { %545 = vmatpush3.bf16.msra.mxu0 %v542_v3  ;;  %v554_v12 = vpack.c.bf16 %v82_v11, %v81_v10  ;;  %v558_v15 = vpack.c.bf16 %v84_v14, %v83_v13  ;;  %v85_v16 = vld [vmem:[#allocation5 + $0x50] sm:$0xff]  ;;  %v86_v17 = vld [vmem:[#allocation5 + $0x58] sm:$0xff]  ;;  %v87_v19 = vld [vmem:[#allocation5 + $0x60] sm:$0xff] }
  0x4e   :  { %547 = vmatprep.subr.bf16.mxu0 %v546_v5  ;;  %v562_v18 = vpack.c.bf16 %v86_v17, %v85_v16  ;;  %v88_v20 = vld [vmem:[#allocation5 + $0x68] sm:$0xff]  ;;  %v89_v22 = vld [vmem:[#allocation5 + $0x70] sm:$0xff]  ;;  %v90_v23 = vld [vmem:[#allocation5 + $0x78] sm:$0xff]  ;;  %p748_p7 = por %p747_p6, %p746_p5 }
  0x4f   :  { %v566_v21 = vpack.c.bf16 %v88_v20, %v87_v19  ;;  %v570_v24 = vpack.c.bf16 %v90_v23, %v89_v22  ;;  %v74_v25 = vld [vmem:[#allocation2 + $0x8] sm:$0xff]  ;;  %v178_v26 = vld [vmem:[#allocation7] sm:$0xff]  ;;  %v179_v27 = vld [vmem:[#allocation7 + $0x8] sm:$0xff] }
  0x50   :  { %v574_v28 = vpack.c.bf16 %v179_v27, %v178_v26  ;;  %v180_v29 = vld [vmem:[#allocation7 + $0x10] sm:$0xff]  ;;  %v181_v30 = vld [vmem:[#allocation7 + $0x18] sm:$0xff]  ;;  %v182_v32 = vld [vmem:[#allocation7 + $0x20] sm:$0xff]  ;;  %p749_p8 = pnand %p748_p7, %p742_p4 }
  0x51   :  { %549 = vmatpush3.bf16.msra.mxu0 %v546_v5  ;;  %v578_v31 = vpack.c.bf16 %v181_v30, %v180_v29  ;;  %v183_v33 = vld [vmem:[#allocation7 + $0x28] sm:$0xff]  ;;  %v184_v35 = vld [vmem:[#allocation7 + $0x30] sm:$0xff]  ;;  %v185_v36 = vld [vmem:[#allocation7 + $0x38] sm:$0xff] }
  0x52   :  { %551 = vmatprep.subr.bf16.mxu0 %v550_v8  ;;  %575 = vmatprep.subr.bf16.mxu1 %v574_v28  ;;  %v582_v34 = vpack.c.bf16 %v183_v33, %v182_v32  ;;  %v586_v37 = vpack.c.bf16 %v185_v36, %v184_v35  ;;  %v186_v38 = vld [vmem:[#allocation7 + $0x40] sm:$0xff]  ;;  %v187_v39 = vld [vmem:[#allocation7 + $0x48] sm:$0xff]  ;;  %v188_v41 = vld [vmem:[#allocation7 + $0x50] sm:$0xff] }
  0x53   :  { %577 = vmatpush3.bf16.msra.mxu1 %v574_v28  ;;  %v590_v40 = vpack.c.bf16 %v187_v39, %v186_v38  ;;  %v189_v42 = vld [vmem:[#allocation7 + $0x58] sm:$0xff]  ;;  %v190_v44 = vld [vmem:[#allocation7 + $0x60] sm:$0xff]  ;;  %v191_v45 = vld [vmem:[#allocation7 + $0x68] sm:$0xff] }
  0x54   :  { %579 = vmatprep.subr.bf16.mxu1 %v578_v31  ;;  %v594_v43 = vpack.c.bf16 %v189_v42, %v188_v41  ;;  %v598_v46 = vpack.c.bf16 %v191_v45, %v190_v44  ;;  %v192_v47 = vld [vmem:[#allocation7 + $0x70] sm:$0xff]  ;;  %v193_v48 = vld [vmem:[#allocation7 + $0x78] sm:$0xff]  ;;  %v271_v50 = vld [vmem:[#allocation8] sm:$0xff] }
  0x55   :  { %553 = vmatpush3.bf16.msra.mxu0 %v550_v8  ;;  %v602_v49 = vpack.c.bf16 %v193_v48, %v192_v47  ;;  %v272_v51 = vld [vmem:[#allocation8 + $0x8] sm:$0xff]  ;;  %v273_v52 = vld [vmem:[#allocation8 + $0x10] sm:$0xff]  ;;  %v274_v54 = vld [vmem:[#allocation8 + $0x18] sm:$0xff] }
  0x56   :  { %555 = vmatprep.subr.bf16.mxu0 %v554_v12  ;;  %v606_v53 = vpack.c.bf16 %v272_v51, %v271_v50  ;;  %v610_v55 = vpack.c.bf16 %v274_v54, %v273_v52  ;;  %v275_v56 = vld [vmem:[#allocation8 + $0x20] sm:$0xff]  ;;  %v276_v57 = vld [vmem:[#allocation8 + $0x28] sm:$0xff]  ;;  %v277_v59 = vld [vmem:[#allocation8 + $0x30] sm:$0xff] }
  0x57   :  { %581 = vmatpush3.bf16.msra.mxu1 %v578_v31  ;;  %v614_v58 = vpack.c.bf16 %v276_v57, %v275_v56  ;;  %v278_v60 = vld [vmem:[#allocation8 + $0x38] sm:$0xff]  ;;  %v279_v62 = vld [vmem:[#allocation8 + $0x40] sm:$0xff]  ;;  %v280_v63 = vld [vmem:[#allocation8 + $0x48] sm:$0xff] }
  0x58   :  { %583 = vmatprep.subr.bf16.mxu1 %v582_v34  ;;  %v618_v61 = vpack.c.bf16 %v278_v60, %v277_v59  ;;  %v622_v0 = vpack.c.bf16 %v280_v63, %v279_v62  ;;  %v281_v1 = vld [vmem:[#allocation8 + $0x50] sm:$0xff]  ;;  %v282_v2 = vld [vmem:[#allocation8 + $0x58] sm:$0xff]  ;;  %v283_v4 = vld [vmem:[#allocation8 + $0x60] sm:$0xff] }
  0x59   :  { %557 = vmatpush3.bf16.msra.mxu0 %v554_v12  ;;  %v626_v3 = vpack.c.bf16 %v282_v2, %v281_v1  ;;  %v284_v5 = vld [vmem:[#allocation8 + $0x68] sm:$0xff]  ;;  %v286_v22 = vld [vmem:[#allocation8 + $0x78] sm:$0xff] }
  0x5a   :  { %559 = vmatprep.subr.bf16.mxu0 %v558_v15  ;;  %v630_v6 = vpack.c.bf16 %v284_v5, %v283_v4 }
  0x5b   :  { %585 = vmatpush3.bf16.msra.mxu1 %v582_v34 }
  0x5c   :  { %587 = vmatprep.subr.bf16.mxu1 %v586_v37 }
  0x5d   :  { %561 = vmatpush3.bf16.msra.mxu0 %v558_v15 }
  0x5e   :  { %563 = vmatprep.subr.bf16.mxu0 %v562_v18 }
  0x5f   :  { %589 = vmatpush3.bf16.msra.mxu1 %v586_v37 }
  0x60   :  { %591 = vmatprep.subr.bf16.mxu1 %v590_v40 }
  0x61   :  { %565 = vmatpush3.bf16.msra.mxu0 %v562_v18 }
  0x62   :  { %567 = vmatprep.subr.bf16.mxu0 %v566_v21 }
  0x63   :  { %593 = vmatpush3.bf16.msra.mxu1 %v590_v40 }
  0x64   :  { %595 = vmatprep.subr.bf16.mxu1 %v594_v43 }
  0x65   :  { %569 = vmatpush3.bf16.msra.mxu0 %v566_v21  ;;  %v285_v21 = vld [vmem:[#allocation8 + $0x70] sm:$0xff] }
  0x66   :  { %571 = vmatprep.subr.bf16.mxu0 %v570_v24  ;;  %v634_v23 = vpack.c.bf16 %v286_v22, %v285_v21 }
  0x67   :  { %597 = vmatpush3.bf16.msra.mxu1 %v594_v43 }
  0x68   :  { %599 = vmatprep.subr.bf16.mxu1 %v598_v46 }
  0x69   :  { %573 = vmatpush3.bf16.msra.mxu0 %v570_v24 }
  0x6a   :  { %607 = vmatprep.subr.bf16.mxu0 %v606_v53 }
  0x6b   :  { %601 = vmatpush3.bf16.msra.mxu1 %v598_v46 }
  0x6c   :  { %470 = vmatmul.mubr.f32.vlgmr.msra.gmra.mrb[0].mxu0 %v74_v25  ;;  %603 = vmatprep.subr.bf16.mxu1 %v602_v49 }
  0x6d   :  { %609 = vmatpush3.bf16.msra.mxu0 %v606_v53 }
  0x6e   :  { %611 = vmatprep.subr.bf16.mxu0 %v610_v55 }
  0x6f   :  { %605 = vmatpush3.bf16.msra.mxu1 %v602_v49 }
  0x71   :  { %613 = vmatpush3.bf16.msra.mxu0 %v610_v55 }
  0x72   :  { %615 = vmatprep.subr.bf16.mxu0 %v614_v58 }
  0x75   :  { %617 = vmatpush3.bf16.msra.mxu0 %v614_v58 }
  0x76   :  { %619 = vmatprep.subr.bf16.mxu0 %v618_v61 }
  0x79   :  { %621 = vmatpush3.bf16.msra.mxu0 %v618_v61 }
  0x7a   :  { %623 = vmatprep.subr.bf16.mxu0 %v622_v0 }
  0x7d   :  { %625 = vmatpush3.bf16.msra.mxu0 %v622_v0 }
  0x7e   :  { %627 = vmatprep.subr.bf16.mxu0 %v626_v3 }
  0x81   :  { %629 = vmatpush3.bf16.msra.mxu0 %v626_v3 }
  0x82   :  { %631 = vmatprep.subr.bf16.mxu0 %v630_v6 }
  0x85   :  { %633 = vmatpush3.bf16.msra.mxu0 %v630_v6 }
  0x86   :  { %635 = vmatprep.subr.bf16.mxu0 %v634_v23 }
  0x89   :  { %637 = vmatpush3.bf16.msra.mxu0 %v634_v23 }
 0x13f   :  { %v471_v7 = vpop.f32.mrb[0].mxu0 }
 0x140   :  { %v167_v8 = vsub.f32 0.0, %v471_v7  ;;  %v157_v9 = vpop.f32.mrb[1].mxu0 }
 0x141   :  { %v166_v10 = vsub.f32 0.0, %v157_v9 }
 0x142   :  { %v170_v11 = vmul.f32 1.442695, %v167_v8 }
 0x143   :  { %v168_v12 = vmul.f32 1.442695, %v166_v10 }
 0x144   :  { %645 = vpow2.f32 %v170_v11 }
 0x145   :  { %647 = vpow2.f32 %v168_v12 }
 0x14e   :  { %v646_v13 = vpop.eup %645 }
 0x14f   :  { %v648_v14 = vpop.eup %647  ;;  %v173_v15 = vadd.f32 1.0, %v646_v13 }
 0x150   :  { %v172_v16 = vadd.f32 1.0, %v648_v14 }
 0x151   :  { %649 = vrcp.f32 %v173_v15 }
 0x152   :  { %651 = vrcp.f32 %v172_v16 }
 0x15b   :  { %v650_v17 = vpop.eup %649 }
 0x15c   :  { %v652_v18 = vpop.eup %651  ;;  %v177_v20 = vmul.f32 %v650_v17, %v471_v7 }
 0x15d   :  { %v176_v19 = vmul.f32 %v652_v18, %v157_v9 }
 0x15f   :  { %504 = vmatprep.mubr.f32.mxu1 %v176_v19 }
 0x160   :  { %505 = vmatmul.mubr.f32.vlgmr.msra.gmra.mrb[0].mxu1 %v177_v20 }
 0x233   :  { %v506_v24 = vpop.f32.mrb[0].mxu1 }
 0x234   :  { %v260_v25 = vpop.f32.mrb[1].mxu1  ;;  %v270_v27 = vmax.f32 %v506_v24, 0.0 }
 0x235   :  { %v269_v26 = vmax.f32 %v260_v25, 0.0 }
 0x237   :  { %539 = vmatprep.mubr.f32.mxu0 %v269_v26 }
 0x238   :  { %540 = vmatmul.mubr.f32.vlgmr.msra.gmra.mrb[2].mxu0 %v270_v27 }
 0x30b   :  { %v541_v28 = vpop.f32.mrb[2].mxu0 }
 0x30c   :  { %363 = vst [vmem:[#allocation10 + $0x8] sm:$0xff] %v541_v28  ;;  %v353_v29 = vpop.f32.mrb[3].mxu0 }
 0x30d   :  { %362 = vst [vmem:[#allocation10] sm:$0xff] %v353_v29 }
 0x30e   :  { %752 = shalt.err (!%p749_p8)
}
 0x30f   :  { %s753_s15 = scalar_lea.hbm %s896_s4, 256 }
 0x310   :  { %p754_p9 = scmp.ne.s32.totalorder %s896_s4, %s753_s15  ;;  %p757_p10 = scmp.lt.u32.totalorder %s753_s15, %s896_s4 }
 0x312   :  { %p759_p11 = pnand %p757_p10, %p754_p9 }
 0x314   :  { %762 = shalt.err (!%p759_p11)
}
 0x315   :  { %375 = dma.vmem_to_hbm [thread:$0]  %s370_s12, 256, %s896_s4, [#allocation4], %s773_s27, %s773_s27, %s774_s28  }
 0x316   :  { %769 = dma.done.wait [#allocation4], 256  }
 0x317   :  { %770 = vsyncadd [#allocation4], 4294967040 }
 0x318   :  { %379 = vsyncpa [#allocation3], 1 }
 0x319   :  { %380 = vsyncpa [#allocation6], 1 }
 0x31a   :  { %381 = vsyncpa [#allocation9], 1 }
 0x31b   :  { %382 = vsyncpa [#allocation4], 1 }

</bundles_post_ra>
